<compile_context>
chip_gen: v6e
topology: v6e:2x2x1
jax: 0.10.0
libtpu: 0.0.40
codegen_flags: <defaults>
</compile_context>

<pallas_src>
import jax
import jax.numpy as jnp
from jax.experimental import pallas as pl
from jax.experimental.pallas import tpu as pltpu


_LANES = 128
_ACC_SUBLANES = 8
_PAD_GRANULE = _ACC_SUBLANES * _LANES      # 1024 elements
_MAX_TILE_ROWS = 2048                      # (2048, 128) f32 block = 1 MiB / input
_NUM_SPLITS = 2                            # leading "parallel" axis (2 TCs on v7x)


def _make_abs_diff_kernel(tile_rows, blocks_per_split, valid_rows, need_mask):
    """Kernel: accumulate per-split (8, 128) partial sums of |x - y|."""

    def kernel(x_ref, y_ref, o_ref):
        s = pl.program_id(0)   # split (TensorCore shard on v7x)
        i = pl.program_id(1)   # reduction step within the split

        @pl.when(i == 0)
        def _():
            o_ref[...] = jnp.zeros_like(o_ref)

        x = x_ref[...]
        y = y_ref[...]
        if x.dtype != jnp.float32:            # keep loads narrow; upcast in vregs
            x = x.astype(jnp.float32)
            y = y.astype(jnp.float32)
        diff = jnp.abs(x - y)                 # (tile_rows, 128) f32

        if need_mask:
            # Rows past the true row count hold garbage (partial tail block /
            # overhang grid steps) -> zero them before accumulating.
            g = s * blocks_per_split + i      # global row-block index
            row0 = g * tile_rows
            local = jax.lax.broadcasted_iota(jnp.int32, diff.shape, 0)
            diff = jnp.where(row0 + local < valid_rows, diff, 0.0)

        # (tile_rows, 128) -> (8, 128): pure elementwise vreg adds (no XLU,
        # no scalar chain). tile_rows is always a multiple of 8.
        partial = jnp.sum(diff.reshape(-1, _ACC_SUBLANES, _LANES), axis=0)
        o_ref[...] += partial[None, :, :]

    return kernel


def _abs_diff_sum(x, y):
    """sum(|x - y|) over equal-shaped arrays via a Pallas TPU reduction."""
    assert x.shape == y.shape
    n = x.size
    xf = x.reshape(-1)
    yf = y.reshape(-1)

    # Only pad when size is not a multiple of 8*128 (rare for NCHW maps);
    # padded zeros contribute |0 - 0| = 0.
    padded = ((n + _PAD_GRANULE - 1) // _PAD_GRANULE) * _PAD_GRANULE
    if padded != n:
        # TODO(synk): this fallback materializes padded copies (extra HBM
        # traffic); common feature-map sizes never take this path.
        pad = padded - n
        xf = jnp.concatenate([xf, jnp.zeros((pad,), xf.dtype)])
        yf = jnp.concatenate([yf, jnp.zeros((pad,), yf.dtype)])

    rows = padded // _LANES                     # multiple of 8
    x2d = xf.reshape(rows, _LANES)              # free reshape (no copy)
    y2d = yf.reshape(rows, _LANES)

    tile_rows = min(_MAX_TILE_ROWS, rows)       # <= 1 MiB f32 per input block
    total_blocks = -(-rows // tile_rows)
    num_splits = _NUM_SPLITS if total_blocks >= _NUM_SPLITS else 1
    blocks_per_split = -(-total_blocks // num_splits)
    coverage = num_splits * blocks_per_split * tile_rows
    need_mask = coverage != rows
    need_clamp = num_splits * blocks_per_split > total_blocks
    last_block = total_blocks - 1

    def in_map(s, i):
        b = s * blocks_per_split + i
        if need_clamp:
            b = jnp.minimum(b, last_block)      # overhang steps re-read last block
        return (b, 0)

    kernel = _make_abs_diff_kernel(tile_rows, blocks_per_split, rows, need_mask)

    partials = pl.pallas_call(
        kernel,
        out_shape=jax.ShapeDtypeStruct(
            (num_splits, _ACC_SUBLANES, _LANES), jnp.float32),
        grid_spec=pltpu.PrefetchScalarGridSpec(
            num_scalar_prefetch=0,
            grid=(num_splits, blocks_per_split),
            in_specs=[
                pl.BlockSpec((tile_rows, _LANES), in_map),
                pl.BlockSpec((tile_rows, _LANES), in_map),
            ],
            out_specs=pl.BlockSpec(
                (1, _ACC_SUBLANES, _LANES), lambda s, i: (s, 0, 0)),
        ),
        compiler_params=pltpu.CompilerParams(
            dimension_semantics=("parallel", "arbitrary"),
        ),
    )(x2d, y2d)

    # Tiny (num_splits, 8, 128) -> scalar reduction in plain JAX.
    return jnp.sum(partials)


class VQWithMSELoss:
    """JAX/Pallas port of the PyTorch VQWithMSELoss module."""

    def __init__(self, codebook_weight):
        self.codebook_weight = float(codebook_weight)

    def __call__(self, codebook_loss, inputs, reconstructions, split="train"):
        n = inputs.size
        rec_sum = _abs_diff_sum(inputs, reconstructions)
        rec_loss_mean = rec_sum / jnp.float32(n)
        nll_loss = rec_loss_mean  # mean(|x - x_rec|)

        quant_loss = jnp.mean(codebook_loss.astype(jnp.float32))
        loss = nll_loss + jnp.float32(self.codebook_weight) * quant_loss

        log = {
            f"{split}/total_loss": loss,
            f"{split}/quant_loss": quant_loss,
            f"{split}/nll_loss": nll_loss,
            f"{split}/rec_loss": rec_loss_mean,
        }
        return loss, log


if __name__ == "__main__":
    key = jax.random.PRNGKey(0)
    k1, k2, k3, k4, k5 = jax.random.split(key, 5)

    module = VQWithMSELoss(codebook_weight=1.0)

    # --- primary small test (NCHW, as the module implies) -------------------
    B, C, H, W = 2, 4, 16, 16
    inputs = jax.random.normal(k1, (B, C, H, W), dtype=jnp.float32)
    reconstructions = jax.random.normal(k2, (B, C, H, W), dtype=jnp.float32)
    codebook_loss = jax.random.uniform(k3, (), dtype=jnp.float32)

    loss, log = module(codebook_loss, inputs, reconstructions, split="train")
    loss = jax.block_until_ready(loss)
    log = jax.tree_util.tree_map(jax.block_until_ready, log)

    ref_rec = jnp.mean(jnp.abs(inputs - reconstructions))
    ref_loss = ref_rec + 1.0 * jnp.mean(codebook_loss)
    assert jnp.allclose(loss, ref_loss, rtol=1e-5, atol=1e-6), (loss, ref_loss)
    assert jnp.allclose(log["train/rec_loss"], ref_rec, rtol=1e-5, atol=1e-6)

    # --- secondary test: exercises the multi-block / 2-split / masked-tail
    #     path (rows > tile_rows, rows % tile_rows != 0) ----------------------
    x2 = jax.random.normal(k4, (2, 16, 96, 96), dtype=jnp.float32)
    y2 = jax.random.normal(k5, (2, 16, 96, 96), dtype=jnp.float32)
    loss2, log2 = module(codebook_loss, x2, y2, split="val")
    loss2 = jax.block_until_ready(loss2)
    ref_rec2 = jnp.mean(jnp.abs(x2 - y2))
    ref_loss2 = ref_rec2 + 1.0 * jnp.mean(codebook_loss)
    assert jnp.allclose(loss2, ref_loss2, rtol=1e-5, atol=1e-6), (loss2, ref_loss2)

    print("KERNEL_OK")
</pallas_src>

<mosaic_0001>
module attributes {stable_mosaic.version = 11 : i64} {
  func.func @kernel(%arg0: i32, %arg1: i32, %arg2: memref<16x128xf32, #tpu.memory_space<vmem>>, %arg3: memref<16x128xf32, #tpu.memory_space<vmem>>, %arg4: memref<1x8x128xf32, #tpu.memory_space<vmem>>) attributes {dimension_semantics = [#tpu.dimension_semantics<parallel>, #tpu.dimension_semantics<arbitrary>], iteration_bounds = array<i64: 1, 1>, scalar_prefetch = 0 : i64, scratch_operands = 0 : i64, tpu.core_type = #tpu.core_type<tc>, window_params = [{transform_indices = @transform_0, window_bounds = array<i64: 16, 128>}, {transform_indices = @transform_1, window_bounds = array<i64: 16, 128>}, {transform_indices = @transform_2, window_bounds = array<i64: 1, 8, 128>}]} {
    %c0_i32 = arith.constant 0 : i32
    %0 = arith.cmpi eq, %arg1, %c0_i32 : i32
    %1 = arith.extui %0 : i1 to i32
    %c0_i32_0 = arith.constant 0 : i32
    %2 = arith.cmpi ne, %1, %c0_i32_0 : i32
    scf.if %2 {
      %cst_10 = arith.constant 0.000000e+00 : f32
      %13 = vector.broadcast %cst_10 : f32 to vector<1x8x128xf32>
      %c0_11 = arith.constant 0 : index
      %c0_12 = arith.constant 0 : index
      %c0_13 = arith.constant 0 : index
      %14 = vector.load %arg4[%c0_11, %c0_12, %c0_13] : memref<1x8x128xf32, #tpu.memory_space<vmem>>, vector<1x8x128xf32>
      tpu.vector_store %arg4[%c0_11, %c0_12, %c0_13], %13 {strides = array<i32>} : memref<1x8x128xf32, #tpu.memory_space<vmem>>, vector<1x8x128xf32>,
    } else {
    }
    %c0 = arith.constant 0 : index
    %c0_1 = arith.constant 0 : index
    %3 = vector.load %arg2[%c0, %c0_1] : memref<16x128xf32, #tpu.memory_space<vmem>>, vector<16x128xf32>
    %c0_2 = arith.constant 0 : index
    %c0_3 = arith.constant 0 : index
    %4 = vector.load %arg3[%c0_2, %c0_3] : memref<16x128xf32, #tpu.memory_space<vmem>>, vector<16x128xf32>
    %5 = arith.subf %3, %4 : vector<16x128xf32>
    %6 = math.absf %5 : vector<16x128xf32>
    %7 = vector.shape_cast %6 : vector<16x128xf32> to vector<2x8x128xf32>
    %cst = arith.constant dense<0.000000e+00> : vector<8x128xf32>
    %8 = vector.multi_reduction <add>, %7, %cst [0] : vector<2x8x128xf32> to vector<8x128xf32>
    %c0_4 = arith.constant 0 : index
    %c0_5 = arith.constant 0 : index
    %c0_6 = arith.constant 0 : index
    %9 = vector.load %arg4[%c0_4, %c0_5, %c0_6] : memref<1x8x128xf32, #tpu.memory_space<vmem>>, vector<1x8x128xf32>
    %10 = vector.shape_cast %8 : vector<8x128xf32> to vector<1x8x128xf32>
    %11 = arith.addf %9, %10 : vector<1x8x128xf32>
    %c0_7 = arith.constant 0 : index
    %c0_8 = arith.constant 0 : index
    %c0_9 = arith.constant 0 : index
    %12 = vector.load %arg4[%c0_7, %c0_8, %c0_9] : memref<1x8x128xf32, #tpu.memory_space<vmem>>, vector<1x8x128xf32>
    tpu.vector_store %arg4[%c0_7, %c0_8, %c0_9], %11 {strides = array<i32>} : memref<1x8x128xf32, #tpu.memory_space<vmem>>, vector<1x8x128xf32>,
    return
  }
  func.func @transform_0(%arg0: i32, %arg1: i32) -> (i32, i32) {
    %c1_i32 = arith.constant 1 : i32
    %0 = arith.muli %arg0, %c1_i32 : i32
    %1 = arith.addi %0, %arg1 : i32
    %c0_i32 = arith.constant 0 : i32
    %c0_i32_0 = arith.constant 0 : i32
    return %1, %c0_i32 : i32, i32
  }
  func.func @transform_1(%arg0: i32, %arg1: i32) -> (i32, i32) {
    %c1_i32 = arith.constant 1 : i32
    %0 = arith.muli %arg0, %c1_i32 : i32
    %1 = arith.addi %0, %arg1 : i32
    %c0_i32 = arith.constant 0 : i32
    %c0_i32_0 = arith.constant 0 : i32
    return %1, %c0_i32 : i32, i32
  }
  func.func @transform_2(%arg0: i32, %arg1: i32) -> (i32, i32, i32) {
    %c0_i32 = arith.constant 0 : i32
    %c0_i32_0 = arith.constant 0 : i32
    %c0_i32_1 = arith.constant 0 : i32
    return %arg0, %c0_i32, %c0_i32_0 : i32, i32, i32
  }
}

</mosaic_0001>

<bundles_post_ra>
// kernel: tpu_custom_call.1
= control target key start
LH: loop header
LB: loop body
LE: loop exit
PB: predicated region body
PF: predicated region fallthrough
CT: control target
= control target key end

     0   :  { %7 = vsyncpa [#allocation3], 0  ;;  %s186_s0 = inlined_call_operand.hbm [shape: f32[16,128], index: 0, kind: input, shape index: {}]   ;;  %s187_s1 = inlined_call_operand.hbm [shape: f32[16,128], index: 1, kind: input, shape index: {}]   ;;  %s188_s2 = inlined_call_operand.hbm [shape: f32[1,8,128], index: 2, kind: output, shape index: {}]  }
   0x1   :  { %8 = vsyncpa [#allocation6], 0 }
   0x2   :  { %9 = vsyncpa [#allocation4], 0  ;;  %s157_s9 = smov [#allocation2]  }
   0x3   :  { %s19_s10 = sshll.u32 %s157_s9, 4  ;;  %s20_s10 = int_to_ptr.vmem [resolvable:$true] %s19_s10 }
   0x4   :  { %s99_s11 = scalar_lea.vmem %s20_s10, 256  ;;  %p104_p1 = scmp.lt.s32.totalorder %s20_s10, %s20_s10 }
   0x5   :  { %p100_p0 = scmp.ne.s32.totalorder %s20_s10, %s99_s11  ;;  %p105_p2 = scmp.lt.s32.totalorder %s99_s11, %s99_s11 }
   0x7   :  { %p106_p3 = por %p105_p2, %p104_p1 }
   0x9   :  { %p107_p4 = pnand %p106_p3, %p100_p0 }
   0xb   :  { %110 = shalt.err (!%p107_p4)
}
   0xc   :  { %s158_s12 = smov 128   ;;  %s159_s13 = smov 8  }
   0xd   :  { %25 = dma.hbm_to_vmem [thread:$0]  %s186_s0, 256, %s20_s10, [#allocation3], %s158_s12, %s158_s12, %s159_s13  }
   0xe   :  { %s160_s16 = smov [#allocation5]  }
   0xf   :  { %s35_s17 = sshll.u32 %s160_s16, 4  ;;  %s36_s17 = int_to_ptr.vmem [resolvable:$true] %s35_s17 }
  0x10   :  { %s119_s18 = scalar_lea.vmem %s36_s17, 256  ;;  %p124_p6 = scmp.lt.s32.totalorder %s36_s17, %s36_s17 }
  0x11   :  { %p120_p5 = scmp.ne.s32.totalorder %s36_s17, %s119_s18  ;;  %p125_p7 = scmp.lt.s32.totalorder %s119_s18, %s119_s18 }
  0x13   :  { %p126_p8 = por %p125_p7, %p124_p6 }
  0x15   :  { %p127_p9 = pnand %p126_p8, %p120_p5 }
  0x17   :  { %130 = shalt.err (!%p127_p9)
}
  0x18   :  { %41 = dma.hbm_to_vmem [thread:$0]  %s187_s1, 256, %s36_s17, [#allocation6], %s158_s12, %s158_s12, %s159_s13  }
  0x19   :  { %151 = dma.done.wait [#allocation3], 256  }
  0x1a   :  { %152 = vsyncadd [#allocation3], 4294967040 }
  0x1b   :  { %153 = dma.done.wait [#allocation6], 256  }
  0x1c   :  { %154 = vsyncadd [#allocation6], 4294967040  ;;  %v57_v0 = vld [vmem:[#allocation2] sm:$0xff]  ;;  %v58_v1 = vld [vmem:[#allocation2 + $0x8] sm:$0xff]  ;;  %s161_s0 = smov [#allocation7]  }
  0x1d   :  { %v59_v2 = vld [vmem:[#allocation5] sm:$0xff]  ;;  %v60_v3 = vld [vmem:[#allocation5 + $0x8] sm:$0xff]  ;;  %s75_s21 = sshll.u32 %s161_s0, 4  ;;  %s76_s21 = int_to_ptr.vmem [resolvable:$true] %s75_s21 }
  0x1e   :  { %v61_v4 = vsub.f32 %v57_v0, %v59_v2  ;;  %v62_v5 = vsub.f32 %v58_v1, %v60_v3  ;;  %s131_s22 = scalar_lea.vmem %s76_s21, 128  ;;  %p136_p11 = scmp.lt.s32.totalorder %s76_s21, %s76_s21 }
  0x1f   :  { %p132_p10 = scmp.ne.s32.totalorder %s76_s21, %s131_s22  ;;  %p137_p12 = scmp.lt.s32.totalorder %s131_s22, %s131_s22 }
  0x20   :  { %v63_v6 = vand.u32 2147483647, %v61_v4  ;;  %v64_v7 = vand.u32 2147483647, %v62_v5 }
  0x21   :  { %p138_p13 = por %p137_p12, %p136_p11 }
  0x22   :  { %v65_v8 = vadd.f32 %v64_v7, %v63_v6 }
  0x23   :  { %p139_p0 = pnand %p138_p13, %p132_p10 }
  0x24   :  { %68 = vst [vmem:[#allocation7] sm:$0xff] %v65_v8 }
  0x25   :  { %142 = shalt.err (!%p139_p0)
}
  0x26   :  { %78 = dma.vmem_to_hbm [thread:$0]  %s76_s21, 128, %s188_s2, [#allocation4]  }
  0x27   :  { %155 = dma.done.wait [#allocation4], 128  }
  0x28   :  { %156 = vsyncadd [#allocation4], 4294967168 }
  0x29   :  { %82 = vsyncpa [#allocation3], 1 }
  0x2a   :  { %83 = vsyncpa [#allocation6], 1 }
  0x2b   :  { %84 = vsyncpa [#allocation4], 1 }

</bundles_post_ra>
